<compile_context>
chip_gen: v7x
topology: tpu7x:2x2x1
jax: 0.10.0
libtpu: 0.0.40
codegen_flags: <defaults>
</compile_context>

<pallas_src>
import functools

import jax
import jax.numpy as jnp
import numpy as np
from jax import lax
from jax.experimental import pallas as pl
from jax.experimental.pallas import tpu as pltpu


# ----------------------------- Pallas kernel -----------------------------

def _embed_ln_kernel(w_ref, tt_ref, ttab_ref, pos_ref, g_ref, b_ref, o_ref, *,
                     n_types, eps):
    """x = words(+overwrites) + position + token_type; out = LayerNorm(x).

    w_ref   : (tile_b, S, H) word-embedding slab (row overwrites pre-applied)
    tt_ref  : (tile_b, S, 1) int32 token-type ids (only 4 B/row streamed)
    ttab_ref: (nt_pad, H)    small token-type table (resident in VMEM)
    pos_ref : (S, H)         position table (resident in VMEM)
    g_ref/b_ref : (1, H)     LayerNorm gamma / beta
    o_ref   : (tile_b, S, H) output slab
    """
    x = w_ref[...] + pos_ref[...][None, :, :]          # pos broadcast over tile_b
    tt = tt_ref[...]                                   # (tile_b, S, 1) int32

    # Token-type embedding selected in-kernel from the tiny resident table
    # (replaces streaming a full (B, S, H) gathered tensor from HBM).
    if n_types == 1:
        x = x + ttab_ref[0][None, None, :]
    elif n_types == 2:
        x = x + jnp.where(tt == 0,
                          ttab_ref[0][None, None, :],
                          ttab_ref[1][None, None, :])
    else:
        for t in range(n_types):                       # small static loop
            x = x + jnp.where(tt == t, 1.0, 0.0) * ttab_ref[t][None, None, :]

    mean = jnp.mean(x, axis=-1, keepdims=True)
    cen = x - mean
    var = jnp.mean(cen * cen, axis=-1, keepdims=True)  # two-pass variance (torch LN)
    y = cen * lax.rsqrt(var + eps)
    o_ref[...] = y * g_ref[...][None, :, :] + b_ref[...][None, :, :]


# ----------------------------- pallas_call wrapper -----------------------------

def _pick_tile_b(B, S, H, stream_budget_bytes):
    """Largest divisor of B whose double-buffered streamed blocks fit the budget,
    capped so grid_b >= 2 when B >= 2 (v7x has two TensorCores to shard across)."""
    per_b = 2 * (2 * S * H * 4 + S * 4)   # in + out f32 slabs + int32 ids, 2x buffered
    divs = [d for d in range(1, B + 1) if B % d == 0]
    fits = [d for d in divs if d * per_b <= stream_budget_bytes]
    tile_b = max(fits) if fits else 1
    if B >= 2 and tile_b == B:
        tile_b = max(d for d in divs if d < B)
    return tile_b


def fused_embed_layernorm(words, token_type_ids, tt_table, pos, gamma, beta, *,
                          n_types, eps, tile_b=None,
                          stream_budget_bytes=12 * 1024 * 1024,
                          vmem_limit_bytes=32 * 1024 * 1024):
    """One pallas_call: 3-way embedding add + LayerNorm, tiled over batches."""
    B, S, H = words.shape
    if tile_b is None:
        tile_b = _pick_tile_b(B, S, H, stream_budget_bytes)
    tile_b = int(min(max(int(tile_b), 1), B))
    while B % tile_b != 0:                # exact divisor -> no jnp.pad copies
        tile_b -= 1
    grid_b = B // tile_b

    tt_ids = token_type_ids.astype(jnp.int32).reshape(B, S, 1)
    nt_pad = tt_table.shape[0]

    kernel = functools.partial(_embed_ln_kernel,
                               n_types=int(n_types), eps=float(eps))

    return pl.pallas_call(
        kernel,
        out_shape=jax.ShapeDtypeStruct((B, S, H), jnp.float32),
        grid_spec=pltpu.PrefetchScalarGridSpec(
            num_scalar_prefetch=0,
            grid=(grid_b,),
            in_specs=[
                pl.BlockSpec((tile_b, S, H), lambda i: (i, 0, 0)),  # words slab
                pl.BlockSpec((tile_b, S, 1), lambda i: (i, 0, 0)),  # token-type ids
                pl.BlockSpec((nt_pad, H), lambda i: (0, 0)),        # token-type table
                pl.BlockSpec((S, H), lambda i: (0, 0)),             # position table
                pl.BlockSpec((1, H), lambda i: (0, 0)),             # LN gamma
                pl.BlockSpec((1, H), lambda i: (0, 0)),             # LN beta
            ],
            out_specs=pl.BlockSpec((tile_b, S, H), lambda i: (i, 0, 0)),
        ),
        compiler_params=pltpu.CompilerParams(
            dimension_semantics=("parallel",),
            vmem_limit_bytes=int(vmem_limit_bytes)),
    )(words, tt_ids, tt_table, pos, gamma.reshape(1, -1), beta.reshape(1, -1))


# ----------------------------- forward glue -----------------------------

def build_write_schedule(B, S):
    """Replicates the PyTorch forward's buggy in-place write loop exactly.

    Returns ordered (batch_i, row_n, kind, u_index); kind 'U' -> Uembedding[i][u],
    'C' -> Cembedding[i].  `n` is deliberately NOT reset per sentence (matches the
    reference), and the `j == len - 20` branch is unreachable for j in
    range(len - 21).  Rows strictly increase, so all (i, n) targets are unique.
    """
    writes = []
    n = 0
    for i in range(B):
        for j in range(S - 21):
            if j == 0:
                n += 4
                writes.append((i, n, "U", 49 - j))
            if j == S - 20:            # unreachable, kept for fidelity
                n += 5
                writes.append((i, n, "C", 0))
            else:
                n += 2
                writes.append((i, n, "U", 49 - j))
    return writes


def my_bert_embedding_forward(params, input_ids, token_type_ids, Uembedding,
                              Cembedding, *, eps=1e-12, n_token_types=2,
                              tile_b=None):
    B, S = input_ids.shape
    H = params["word_emb"].shape[1]
    din = Uembedding.shape[-1]

    # TODO(synk): the word-embedding lookup is a data-dependent row gather with
    # no rectangular BlockSpec; left as one XLA gather (a real 30k-row BERT
    # vocab would not fit VMEM anyway).
    words = jnp.take(params["word_emb"], input_ids, axis=0).astype(jnp.float32)

    # Static write schedule -> one gather of matmul sources, ONE vec_model
    # matmul in glue (hoisted out of the kernel grid), one scatter of the rows.
    writes = build_write_schedule(B, S)
    if writes:
        i_arr = np.array([w[0] for w in writes], dtype=np.int32)
        n_arr = np.array([w[1] for w in writes], dtype=np.int32)
        is_u = np.array([w[2] == "U" for w in writes])
        u_arr = np.array([w[3] for w in writes], dtype=np.int32)
        assert int(n_arr.max()) < S, \
            "in-place write row out of range (module bug surfaces for larger B)"
        assert len({(int(a), int(b)) for a, b in zip(i_arr, n_arr)}) == len(writes)

        u_src = Uembedding[i_arr, u_arr]                     # (NW, 400)
        if bool(is_u.all()):
            src = u_src.astype(jnp.float32)
        else:
            src = jnp.where(jnp.asarray(is_u)[:, None], u_src,
                            Cembedding[i_arr]).astype(jnp.float32)

        # vec_model Linear(400 -> 768), computed exactly once.
        vecs = src @ params["vec_w_t"] + params["vec_b"]     # (NW, H)

        # TODO(synk): data-dependent row overwrite done as one XLA scatter on
        # unique static indices; for very large B*S a per-tile scalar-prefetch
        # in-kernel write would avoid this extra (B,S,H) pass.
        words = words.at[jnp.asarray(i_arr), jnp.asarray(n_arr)].set(vecs)

    # Small token-type table kept resident in VMEM; only the int32 ids are
    # streamed (4 B/row instead of a (B,S,H) f32 gather stream).
    tt_table = params["token_type_emb"][:n_token_types].astype(jnp.float32)
    nt_pad = max(8, n_token_types)
    if nt_pad != n_token_types:
        tt_table = jnp.pad(tt_table, ((0, nt_pad - n_token_types), (0, 0)))

    pos = params["pos_emb"][:S]

    # Dropout == identity (eval mode).
    return fused_embed_layernorm(
        words, token_type_ids, tt_table, pos,
        params["ln_gamma"], params["ln_beta"],
        n_types=n_token_types, eps=eps, tile_b=tile_b)


# ----------------------------- reference (pure JAX) -----------------------------

def reference_forward(params, input_ids, token_type_ids, Uembedding, Cembedding,
                      *, eps=1e-12):
    B, S = input_ids.shape
    words = jnp.take(params["word_emb"], input_ids, axis=0)
    tok_type = jnp.take(params["token_type_emb"], token_type_ids, axis=0)
    pos = params["pos_emb"][:S]
    for (i, n, kind, u) in build_write_schedule(B, S):
        src = Uembedding[i, u] if kind == "U" else Cembedding[i]
        vec = src @ params["vec_w_t"] + params["vec_b"]
        words = words.at[i, n].set(vec)
    x = words + pos[None] + tok_type
    mean = jnp.mean(x, axis=-1, keepdims=True)
    var = jnp.mean(jnp.square(x - mean), axis=-1, keepdims=True)
    return (x - mean) / jnp.sqrt(var + eps) * params["ln_gamma"] + params["ln_beta"]


# ----------------------------- main -----------------------------

if __name__ == "__main__":
    # Small-but-consistent config (hidden must be 768 because vec_model is
    # Linear(400, 768) and its output is written into words_embeddings rows).
    VOCAB = 100
    HIDDEN = 768
    MAX_POS = 32
    EPS = 1e-12
    B, S = 2, 24            # S chosen so the in-place write indices stay in-bounds
    U_LEN, U_DIM = 50, 400
    N_TOKEN_TYPES = 2

    key = jax.random.PRNGKey(0)
    ks = jax.random.split(key, 10)

    params = {
        "word_emb": 0.02 * jax.random.normal(ks[0], (VOCAB, HIDDEN), jnp.float32),
        "pos_emb": 0.02 * jax.random.normal(ks[1], (MAX_POS, HIDDEN), jnp.float32),
        "token_type_emb": 0.02 * jax.random.normal(ks[2], (VOCAB, HIDDEN), jnp.float32),
        "ln_gamma": jnp.ones((HIDDEN,), jnp.float32),
        "ln_beta": jnp.zeros((HIDDEN,), jnp.float32),
        # nn.Linear(400, 768): weight (768, 400); store transposed (400, 768).
        "vec_w_t": 0.05 * jax.random.normal(ks[3], (U_DIM, HIDDEN), jnp.float32),
        "vec_b": 0.05 * jax.random.normal(ks[4], (HIDDEN,), jnp.float32),
    }

    input_ids = jax.random.randint(ks[5], (B, S), 0, VOCAB, dtype=jnp.int32)
    token_type_ids = jax.random.randint(ks[6], (B, S), 0, N_TOKEN_TYPES,
                                        dtype=jnp.int32)
    Uembedding = jax.random.normal(ks[7], (B, U_LEN, U_DIM), jnp.float32)
    Cembedding = jax.random.normal(ks[8], (B, U_DIM), jnp.float32)  # unreachable branch

    out = my_bert_embedding_forward(params, input_ids, token_type_ids,
                                    Uembedding, Cembedding,
                                    eps=EPS, n_token_types=N_TOKEN_TYPES)
    out = jax.block_until_ready(out)

    ref = jax.block_until_ready(
        reference_forward(params, input_ids, token_type_ids, Uembedding,
                          Cembedding, eps=EPS))

    assert out.shape == (B, S, HIDDEN), out.shape
    np.testing.assert_allclose(np.asarray(out), np.asarray(ref),
                               atol=1e-4, rtol=1e-4)
    print("KERNEL_OK")
</pallas_src>

<mosaic_0001>
module attributes {stable_mosaic.version = 11 : i64} {
  func.func @_embed_ln_kernel(%arg0: i32, %arg1: memref<1x24x768xf32, #tpu.memory_space<vmem>>, %arg2: memref<1x24x1xi32, #tpu.memory_space<vmem>>, %arg3: memref<8x768xf32, #tpu.memory_space<vmem>>, %arg4: memref<24x768xf32, #tpu.memory_space<vmem>>, %arg5: memref<1x768xf32, #tpu.memory_space<vmem>>, %arg6: memref<1x768xf32, #tpu.memory_space<vmem>>, %arg7: memref<1x24x768xf32, #tpu.memory_space<vmem>>) attributes {dimension_semantics = [#tpu.dimension_semantics<parallel>], iteration_bounds = array<i64: 2>, scalar_prefetch = 0 : i64, scratch_operands = 0 : i64, tpu.core_type = #tpu.core_type<tc>, window_params = [{transform_indices = @transform_0, window_bounds = array<i64: 1, 24, 768>}, {transform_indices = @transform_1, window_bounds = array<i64: 1, 24, 1>}, {pipeline_mode = #tpu.pipeline_mode<synchronous>, transform_indices = @transform_2, window_bounds = array<i64: 8, 768>}, {pipeline_mode = #tpu.pipeline_mode<synchronous>, transform_indices = @transform_3, window_bounds = array<i64: 24, 768>}, {pipeline_mode = #tpu.pipeline_mode<synchronous>, transform_indices = @transform_4, window_bounds = array<i64: 1, 768>}, {pipeline_mode = #tpu.pipeline_mode<synchronous>, transform_indices = @transform_5, window_bounds = array<i64: 1, 768>}, {transform_indices = @transform_6, window_bounds = array<i64: 1, 24, 768>}]} {
    %c0 = arith.constant 0 : index
    %c0_0 = arith.constant 0 : index
    %c0_1 = arith.constant 0 : index
    %0 = vector.load %arg1[%c0, %c0_0, %c0_1] : memref<1x24x768xf32, #tpu.memory_space<vmem>>, vector<1x24x768xf32>
    %c0_2 = arith.constant 0 : index
    %c0_3 = arith.constant 0 : index
    %1 = vector.load %arg4[%c0_2, %c0_3] : memref<24x768xf32, #tpu.memory_space<vmem>>, vector<24x768xf32>
    %2 = vector.shape_cast %1 : vector<24x768xf32> to vector<1x24x768xf32>
    %3 = arith.addf %0, %2 : vector<1x24x768xf32>
    %c0_4 = arith.constant 0 : index
    %c0_5 = arith.constant 0 : index
    %c0_6 = arith.constant 0 : index
    %4 = vector.load %arg2[%c0_4, %c0_5, %c0_6] : memref<1x24x1xi32, #tpu.memory_space<vmem>>, vector<1x24x1xi32>
    %c0_i32 = arith.constant 0 : i32
    %5 = vector.broadcast %c0_i32 : i32 to vector<1x24x1xi32>
    %6 = arith.cmpi eq, %4, %5 : vector<1x24x1xi32>
    %c0_7 = arith.constant 0 : index
    %c0_8 = arith.constant 0 : index
    %7 = vector.load %arg3[%c0_7, %c0_8] : memref<8x768xf32, #tpu.memory_space<vmem>>, vector<1x768xf32>
    %8 = vector.shape_cast %7 : vector<1x768xf32> to vector<768xf32>
    %9 = vector.shape_cast %8 : vector<768xf32> to vector<1x1x768xf32>
    %c1 = arith.constant 1 : index
    %c0_9 = arith.constant 0 : index
    %10 = vector.load %arg3[%c1, %c0_9] : memref<8x768xf32, #tpu.memory_space<vmem>>, vector<1x768xf32>
    %11 = vector.shape_cast %10 : vector<1x768xf32> to vector<768xf32>
    %12 = vector.shape_cast %11 : vector<768xf32> to vector<1x1x768xf32>
    %13 = vector.shape_cast %6 : vector<1x24x1xi1> to vector<1x24x1xi1>
    %14 = vector.broadcast %13 : vector<1x24x1xi1> to vector<1x24x768xi1>
    %15 = vector.shape_cast %9 : vector<1x1x768xf32> to vector<1x1x768xf32>
    %16 = vector.broadcast %15 : vector<1x1x768xf32> to vector<1x24x768xf32>
    %17 = vector.shape_cast %12 : vector<1x1x768xf32> to vector<1x1x768xf32>
    %18 = vector.broadcast %17 : vector<1x1x768xf32> to vector<1x24x768xf32>
    %19 = arith.select %14, %16, %18 : vector<1x24x768xi1>, vector<1x24x768xf32>
    %20 = arith.addf %3, %19 : vector<1x24x768xf32>
    %cst = arith.constant dense<0.000000e+00> : vector<1x24xf32>
    %21 = vector.multi_reduction <add>, %20, %cst [2] : vector<1x24x768xf32> to vector<1x24xf32>
    %22 = vector.shape_cast %21 : vector<1x24xf32> to vector<1x24x1xf32>
    %cst_10 = arith.constant 7.680000e+02 : f32
    %23 = vector.broadcast %cst_10 : f32 to vector<1x24x1xf32>
    %24 = arith.divf %22, %23 : vector<1x24x1xf32>
    %25 = vector.broadcast %24 : vector<1x24x1xf32> to vector<1x24x768xf32>
    %26 = arith.subf %20, %25 : vector<1x24x768xf32>
    %27 = arith.mulf %26, %26 : vector<1x24x768xf32>
    %cst_11 = arith.constant dense<0.000000e+00> : vector<1x24xf32>
    %28 = vector.multi_reduction <add>, %27, %cst_11 [2] : vector<1x24x768xf32> to vector<1x24xf32>
    %29 = vector.shape_cast %28 : vector<1x24xf32> to vector<1x24x1xf32>
    %cst_12 = arith.constant 7.680000e+02 : f32
    %30 = vector.broadcast %cst_12 : f32 to vector<1x24x1xf32>
    %31 = arith.divf %29, %30 : vector<1x24x1xf32>
    %cst_13 = arith.constant 9.99999996E-13 : f32
    %32 = vector.broadcast %cst_13 : f32 to vector<1x24x1xf32>
    %33 = arith.addf %31, %32 : vector<1x24x1xf32>
    %34 = math.rsqrt %33 : vector<1x24x1xf32>
    %35 = vector.broadcast %34 : vector<1x24x1xf32> to vector<1x24x768xf32>
    %36 = arith.mulf %26, %35 : vector<1x24x768xf32>
    %c0_14 = arith.constant 0 : index
    %c0_15 = arith.constant 0 : index
    %37 = vector.load %arg5[%c0_14, %c0_15] : memref<1x768xf32, #tpu.memory_space<vmem>>, vector<1x768xf32>
    %38 = vector.shape_cast %37 : vector<1x768xf32> to vector<1x1x768xf32>
    %39 = vector.broadcast %38 : vector<1x1x768xf32> to vector<1x24x768xf32>
    %40 = arith.mulf %36, %39 : vector<1x24x768xf32>
    %c0_16 = arith.constant 0 : index
    %c0_17 = arith.constant 0 : index
    %41 = vector.load %arg6[%c0_16, %c0_17] : memref<1x768xf32, #tpu.memory_space<vmem>>, vector<1x768xf32>
    %42 = vector.shape_cast %41 : vector<1x768xf32> to vector<1x1x768xf32>
    %43 = vector.broadcast %42 : vector<1x1x768xf32> to vector<1x24x768xf32>
    %44 = arith.addf %40, %43 : vector<1x24x768xf32>
    %c0_18 = arith.constant 0 : index
    %c0_19 = arith.constant 0 : index
    %c0_20 = arith.constant 0 : index
    %45 = vector.load %arg7[%c0_18, %c0_19, %c0_20] : memref<1x24x768xf32, #tpu.memory_space<vmem>>, vector<1x24x768xf32>
    tpu.vector_store %arg7[%c0_18, %c0_19, %c0_20], %44 {strides = array<i32>} : memref<1x24x768xf32, #tpu.memory_space<vmem>>, vector<1x24x768xf32>,
    return
  }
  func.func @transform_0(%arg0: i32) -> (i32, i32, i32) {
    %c0_i32 = arith.constant 0 : i32
    %c0_i32_0 = arith.constant 0 : i32
    %c0_i32_1 = arith.constant 0 : i32
    return %arg0, %c0_i32, %c0_i32_0 : i32, i32, i32
  }
  func.func @transform_1(%arg0: i32) -> (i32, i32, i32) {
    %c0_i32 = arith.constant 0 : i32
    %c0_i32_0 = arith.constant 0 : i32
    %c0_i32_1 = arith.constant 0 : i32
    return %arg0, %c0_i32, %c0_i32_0 : i32, i32, i32
  }
  func.func @transform_2(%arg0: i32) -> (i32, i32) {
    %c0_i32 = arith.constant 0 : i32
    %c0_i32_0 = arith.constant 0 : i32
    %c0_i32_1 = arith.constant 0 : i32
    return %c0_i32, %c0_i32_0 : i32, i32
  }
  func.func @transform_3(%arg0: i32) -> (i32, i32) {
    %c0_i32 = arith.constant 0 : i32
    %c0_i32_0 = arith.constant 0 : i32
    %c0_i32_1 = arith.constant 0 : i32
    return %c0_i32, %c0_i32_0 : i32, i32
  }
  func.func @transform_4(%arg0: i32) -> (i32, i32) {
    %c0_i32 = arith.constant 0 : i32
    %c0_i32_0 = arith.constant 0 : i32
    %c0_i32_1 = arith.constant 0 : i32
    return %c0_i32, %c0_i32_0 : i32, i32
  }
  func.func @transform_5(%arg0: i32) -> (i32, i32) {
    %c0_i32 = arith.constant 0 : i32
    %c0_i32_0 = arith.constant 0 : i32
    %c0_i32_1 = arith.constant 0 : i32
    return %c0_i32, %c0_i32_0 : i32, i32
  }
  func.func @transform_6(%arg0: i32) -> (i32, i32, i32) {
    %c0_i32 = arith.constant 0 : i32
    %c0_i32_0 = arith.constant 0 : i32
    %c0_i32_1 = arith.constant 0 : i32
    return %arg0, %c0_i32, %c0_i32_0 : i32, i32, i32
  }
}

</mosaic_0001>

<bundles_post_ra>
// kernel: tpu_custom_call.1
= control target key start
LH: loop header
LB: loop body
LE: loop exit
PB: predicated region body
PF: predicated region fallthrough
CT: control target
= control target key end

     0   :  { %11 = vsyncpa [#allocation3], 0  ;;  %s1619_s0 = inlined_call_operand.hbm [shape: f32[2,24,768], index: 0, kind: input, shape index: {}]   ;;  %s1620_s1 = inlined_call_operand.vmem [shape: s32[2,24,1], index: 1, kind: input, shape index: {}]   ;;  %s1621_s2 = inlined_call_operand.vmem [shape: f32[8,768], index: 2, kind: input, shape index: {}]   ;;  %s1622_s3 = inlined_call_operand.hbm [shape: f32[24,768], index: 3, kind: input, shape index: {}]   ;;  %s1623_s4 = inlined_call_operand.vmem [shape: f32[1,768], index: 4, kind: input, shape index: {}]   ;;  %s1624_s5 = inlined_call_operand.vmem [shape: f32[1,768], index: 5, kind: input, shape index: {}]   ;;  %s1625_s6 = inlined_call_operand.hbm [shape: f32[2,24,768], index: 6, kind: output, shape index: {}]  }
   0x1   :  { %13 = vsyncpa [#allocation3 + $0x1], 0 }
   0x2   :  { %14 = vsyncpa [#allocation6], 0 }
   0x3   :  { %15 = vsyncpa [#allocation4], 0 }
   0x4   :  { %17 = vsyncpa [#allocation4 + $0x1], 0  ;;  %s1082_s21 = smov 0   ;;  %s1084_s22 = smov 0  }
   0x5   :  { %s1086_s23 = smov 0   ;;  %s1088_s24 = smov 0  }
   0x6 LB: > { %s1103_s25 = sadd.s32 4294967295, %s1037_s24   ;;  %s821_s26 = sadd.s32 4294967294, %s1037_s24   ;;  %s1037_s24 = sphi %s1088_s24, %s1649_s24   ;;  %s1033_s23 = sphi %s1086_s23, %s1648_s23   ;;  %s1029_s22 = sphi %s1084_s22, %s1647_s22   ;;  %s1025_s21 = sphi %s1082_s21, %s1646_s21  }
   0x7   : > { %p43_p0 = scmp.ne.s32.totalorder %s1029_s22, %s1025_s21  ;;  %p1626_p1 = scmp.eq.s32.totalorder %s1103_s25, 0 }
   0x8   : > { %p183_p3 = scmp.eq.s32.totalorder %s821_s26, 1  ;;  %p822_p5 = scmp.ge.s32.totalorder %s1037_s24, 1 }
   0x9   : > { %p1112_p4 = por %p1626_p1, %p43_p0  ;;  %p190_p7 = scmp.lt.s32.totalorder %s1037_s24, 3 }
   0xa   : > { %p1117_p6 = por %p183_p3, %p43_p0  ;;  %s1039_s30 = smov [#allocation5]  }
   0xb   : > { %s1631_s27 = scalar_select %p1112_p4, 1, 0 }
   0xc   : > { %s1632_s28 = scalar_select %p1117_p6, 1, 0 }
   0xd   : > { %p1122_p8 = pnand %p822_p5, %p190_p7  ;;  %s205_s7 = sshll.u32 %s1039_s30, 4  ;;  %s1126_s7 = int_to_ptr.vmem [resolvable:$true] %s205_s7 }
   0xe   : > { %s1138_s9 = sadd.s32 1, %s1037_s24   ;;  %s30_s10 = sadd.s32 1, %s1033_s23 }
   0xf   : > { %s1633_s29 = scalar_select %p1122_p8, 1, 0 }
  0x10   : > { %p847_p9 = pneg %p1122_p8  ;;  %s27_s11 = ssub.s32 %s1037_s24, %s1138_s9 }
  0x11   : > { %s909_s14 = scalar_lea.hbm %s1622_s3, 2304 }
  0x12   : > { %p1133_p11 = pnand %p847_p9, %p1626_p1  ;;  %p910_p12 = scmp.ne.s32.totalorder %s1622_s3, %s909_s14 }
  0x13   : > { %p916_p5 = scmp.lt.u32.totalorder %s909_s14, %s1622_s3 }
  0x14   : > { %p911_p13 = pneg %p1133_p11 }
  0x16   : > { %p912_p0 = pnand %p911_p13, %p910_p12 }
  0x18   : > { %p913_p3 = pneg %p912_p0 }
  0x1a   : > { %p918_p7 = pnand %p916_p5, %p913_p3 }
  0x1c   : > { %921 = shalt.err (!%p918_p7)
}
  0x1d   : > { %s922_s19 = scalar_lea.vmem %s1126_s7, 2304  ;;  %p930_p2 = scmp.lt.s32.totalorder %s1126_s7, %s1126_s7 }
  0x1e   : > { %p923_p9 = scmp.ne.s32.totalorder %s1126_s7, %s922_s19  ;;  %p931_p6 = scmp.lt.s32.totalorder %s922_s19, %s922_s19 }
  0x20   : > { %p925_p10 = pnand %p923_p9, %p911_p13  ;;  %p932_p4 = por %p931_p6, %p930_p2 }
  0x22   : > { %p926_p1 = pneg %p925_p10 }
  0x24   : > { %p933_p8 = pnand %p932_p4, %p926_p1 }
  0x26   : > { %936 = shalt.err (!%p933_p8)
}
  0x27   : > { %s1629_s20 = smov 768   ;;  %s1630_s26 = smov 48  }
  0x28   : > { %850 = dma.hbm_to_vmem [thread:$0]  (!%p1133_p11), %s1622_s3, 2304, %s1126_s7, [#allocation6], %s1629_s20, %s1629_s20, %s1630_s26  }
  0x29   : > { %p28_p1 = scmp.eq.s32.totalorder %s27_s11, 0  ;;  %p37_p2 = scmp.ne.s32.totalorder %s1033_s23, %s1029_s22 }
  0x2a   : > { %p38_p4 = scmp.eq.s32.totalorder %s1037_s24, 0  ;;  %p860_p6 = scmp.lt.s32.totalorder %s1037_s24, 2 }
  0x2b   : > { %s1172_s13 = scalar_select %p28_p1, %s1033_s23, %s30_s10  }
  0x2c   : > { %p39_p8 = por %p38_p4, %p37_p2  ;;  %p1635_p10 = scmp.eq.s32.totalorder %s1103_s25, 1 }
  0x2d   : > { %s225_s8 = sand.u32 1, %s1033_s23   ;;  %s835_s15 = smul.u32 2304, %s1037_s24 }
  0x2e   : > { %p1176_p12 = por %p1635_p10, %p37_p2  ;;  %s834_s16 = smul.u32 144, %s225_s8 }
  0x2f   : > { %p1182_p13 = pnand %p860_p6, %p39_p8  ;;  %s1189_s10 = scalar_lea.hbm %s1619_s0, %s835_s15 }
  0x30   : > { %s229_s18 = scalar_lea.vmem [#allocation2], %s834_s16  ;;  %s1193_s30 = scalar_lea.sflag [#allocation3], %s225_s8 }
  0x31   : > { %s236_s19 = sshll.u32 %s229_s18, 4  ;;  %s937_s12 = scalar_lea.hbm %s1189_s10, 2304  ;;  %s1191_s19 = int_to_ptr.vmem [resolvable:$true] %s236_s19 }
  0x32   : > { %p938_p11 = scmp.ne.s32.totalorder %s1189_s10, %s937_s12  ;;  %p939_p0 = pneg %p1182_p13 }
  0x33   : > { %s942_s11 = scalar_lea.hbm %s1619_s0, 4608  ;;  %p943_p7 = scmp.lt.u32.totalorder %s1189_s10, %s1619_s0 }
  0x34   : > { %p940_p3 = pnand %p939_p0, %p938_p11  ;;  %p944_p9 = scmp.lt.u32.totalorder %s942_s11, %s937_s12 }
  0x35   : > { %p946_p2 = scmp.lt.u32.totalorder %s937_s12, %s1189_s10 }
  0x36   : > { %p941_p5 = pneg %p940_p3  ;;  %p945_p1 = por %p944_p9, %p943_p7 }
  0x38   : > { %p947_p4 = por %p946_p2, %p945_p1 }
  0x3a   : > { %p948_p6 = pnand %p947_p4, %p941_p5 }
  0x3c   : > { %951 = shalt.err (!%p948_p6)
}
  0x3d   : > { %s952_s8 = scalar_lea.vmem %s1191_s19, 2304  ;;  %s1042_s16 = smov [#allocation2]  }
  0x3e   : > { %p953_p8 = scmp.ne.s32.totalorder %s1191_s19, %s952_s8  ;;  %s957_s18 = sshll.u32 %s1042_s16, 4  ;;  %s958_s18 = int_to_ptr.vmem [resolvable:$false] %s957_s18 }
  0x3f   : > { %s959_s20 = scalar_lea.vmem %s958_s18, 4608  ;;  %p960_p3 = scmp.lt.s32.totalorder %s1191_s19, %s958_s18 }
  0x40   : > { %p955_p10 = pnand %p953_p8, %p939_p0  ;;  %p961_p7 = scmp.lt.s32.totalorder %s959_s20, %s952_s8 }
  0x42   : > { %p956_p11 = pneg %p955_p10  ;;  %p962_p9 = por %p961_p7, %p960_p3 }
  0x44   : > { %p963_p1 = pnand %p962_p9, %p956_p11 }
  0x46   : > { %966 = shalt.err (!%p963_p1)
}
  0x47   : > { %s1638_s26 = smov 48   ;;  %s1639_s12 = smov 768  }
  0x48   : > { %854 = dma.hbm_to_vmem [thread:$0]  (!%p1182_p13), %s1189_s10, 2304, %s1191_s19, %s1193_s30, %s1639_s12, %s1639_s12, %s1638_s26  }
  0x49   : > { %p1640_p0 = scmp.ne.s32.totalorder %s1633_s29, 0 }
  0x4a   : > { %s1227_s15 = sand.u32 (!%p1640_p0), 1, %s1029_s22   ;;  %p1641_p5 = scmp.ne.s32.totalorder (!%p1640_p0), %s1631_s27, 0 }
  0x4b   : > { %256 = sbr.rel (%p1640_p0) target bundleno = 587 (0x24b), region = 44  ;;  %s259_s11 = scalar_lea.sflag (!%p1640_p0), [#allocation3], %s1227_s15 }
  0x4c   : > { %s836_s7 = smul.u32 (!%p1640_p0), 144, %s1227_s15 }
  0x4e   : > { %s1233_s17 = scalar_lea.vmem (!%p1640_p0), [#allocation2], %s836_s7 }
  0x52   : > { %1012 = dma.done.wait (%p1641_p5), %s259_s11, 2304  }
  0x53   : > { %1014 = vsyncadd (%p1641_p5), %s259_s11, 4294964992  ;;  %p1642_p13 = scmp.eq.s32.totalorder %s1103_s25, 0 }
  0x55   : > { %1016 = dma.done.wait (%p1642_p13), [#allocation6], 2304   ;;  %p1643_p2 = pmov %p1642_p13 }
  0x56   : > { %p300_p4 = scmp.lt.s32.totalorder %s1103_s25, 1  ;;  %v1043_v0 = vmov 0   ;;  %v388_v7 = vlaneseq  ;;  %v365_v9 = vld [vmem:[%s1621_s2] ss:$8 sm:$0xf]  ;;  %s713_s20 = scalar_lea.sflag [#allocation4], %s1227_s15 }
  0x57   : > { %1018 = vsyncadd (%p1643_p2), [#allocation6], 4294964992  ;;  %902 = vset.pattern.permute.xlu1 %v1043_v0  ;;  %901 = vset.pattern.permute.xlu0 %v1043_v0  ;;  %v366_v10 = vld [vmem:[%s1621_s2] ss:$8 sm:$0x30]  ;;  %v329_v28 = vld [vmem:[#allocation5 + $0x30] sm:$0xff] }
  0x58   : > { %s301_s29 = scalar_select %p300_p4, %s1103_s25, 1  ;;  %v389_v8 = vshrl.u32 %v388_v7, 7  ;;  %v829_v11 = vld [vmem:[%s1621_s2 + $0x1] ss:$8 sm:$0xf]  ;;  %v367_v13 = vor.u32 %v366_v10, %v365_v9 }
  0x59   : > { %v830_v12 = vld [vmem:[%s1621_s2 + $0x1] ss:$8 sm:$0x30]  ;;  %v330_v30 = vld [vmem:[#allocation5 + $0x38] sm:$0xff]  ;;  %v325_v39 = vld [vmem:[#allocation5 + $0x10] sm:$0xff]  ;;  %s1044_s12 = smov [#allocation7]  }
  0x5a   : > { %s837_s10 = smul.u32 24, %s301_s29  ;;  %v1260_v14 = vsub.s32 0, %v389_v8  ;;  %v371_v15 = vor.u32 %v830_v12, %v829_v11  ;;  %v1262_v16 = vsub.s32 1, %v389_v8  ;;  %v1264_v17 = vsub.s32 2, %v389_v8  ;;  %v317_v18 = vld [vmem:[%s1233_s17 + $0x60] sm:$0xff]  ;;  %v318_v20 = vld [vmem:[%s1233_s17 + $0x68] sm:$0xff] }
  0x5b   : > { %v335_v19 = vld [vmem:[#allocation5 + $0x60] sm:$0xff]  ;;  %v336_v21 = vld [vmem:[#allocation5 + $0x68] sm:$0xff]  ;;  %v1277_v33 = vsub.s32 3, %v389_v8  ;;  %v1288_v40 = vsub.s32 4, %v389_v8  ;;  %v326_v44 = vld [vmem:[#allocation5 + $0x18] sm:$0xff]  ;;  %v1296_v47 = vsub.s32 5, %v389_v8 }
  0x5c   : > { %s304_s8 = scalar_lea.vmem %s1620_s1, %s837_s10  ;;  %v305_v22 = vld [vmem:[%s1233_s17] sm:$0xff]  ;;  %v306_v23 = vld [vmem:[%s1233_s17 + $0x8] sm:$0xff]  ;;  %v311_v26 = vld [vmem:[%s1233_s17 + $0x30] sm:$0xff]  ;;  %v1273_v29 = vrot.slane %v367_v13, %v1260_v14  ;;  %v1280_v34 = vrot.slane %v367_v13, %v1262_v16  ;;  %v1283_v35 = vrot.slane %v367_v13, %v1264_v17  ;;  %v422_v36 = vrot.slane %v371_v15, %v1260_v14  ;;  %s971_s11 = sshll.u32 %s1044_s12, 4  ;;  %s972_s11 = int_to_ptr.vmem [resolvable:$false] %s971_s11 }
  0x5d   : > { %v361_v1 = vld [vmem:[%s304_s8 + $0x10] sm:$0xff]  ;;  %v359_v2 = vld [vmem:[%s304_s8] sm:$0xff]  ;;  %v360_v3 = vld [vmem:[%s304_s8 + $0x8] sm:$0xff]  ;;  %v426_v41 = vrot.slane %v371_v15, %v1262_v16  ;;  %v1292_v42 = vrot.slane %v371_v15, %v1264_v17  ;;  %v1294_v43 = vadd.f32 %v335_v19, %v317_v18  ;;  %v354_v48 = vadd.f32 %v336_v21, %v318_v20  ;;  %s1516_s8 = scalar_lea.vmem [#allocation7], %s836_s7  ;;  %s838_s7 = smul.u32 2304, %s1103_s25 }
  0x5e   : > { %vm364_vm0 = vcmp.eq.s32.totalorder %v361_v1, 0  ;;  %vm362_vm1 = vcmp.eq.s32.totalorder %v359_v2, 0  ;;  %vm363_vm2 = vcmp.eq.s32.totalorder %v360_v3, 0  ;;  %v323_v24 = vld [vmem:[#allocation5] sm:$0xff]  ;;  %v324_v25 = vld [vmem:[#allocation5 + $0x8] sm:$0xff]  ;;  %v347_v51 = vadd.f32 %v329_v28, %v311_v26  ;;  %v337_v11 = vld [vmem:[#allocation5 + $0x70] sm:$0xff] }
  0x5f   : > { %v374_v4 = vsel %vm364_vm0, 1, %v1043_v0  ;;  %v372_v5 = vsel %vm362_vm1, 1, %v1043_v0  ;;  %v373_v6 = vsel %vm363_vm2, 1, %v1043_v0  ;;  %v312_v27 = vld [vmem:[%s1233_s17 + $0x38] sm:$0xff]  ;;  %v307_v31 = vld [vmem:[%s1233_s17 + $0x10] sm:$0xff]  ;;  %v309_v37 = vld [vmem:[%s1233_s17 + $0x20] sm:$0xff]  ;;  %v341_v49 = vadd.f32 %v323_v24, %v305_v22  ;;  %s1565_s18 = scalar_lea.hbm %s1625_s6, %s838_s7 }
  0x60   : > { %382 = vperm.xlu1 %902, %v374_v4   ;;  %376 = vperm.xlu0 %901, %v372_v5   ;;  %v308_v32 = vld [vmem:[%s1233_s17 + $0x18] sm:$0xff]  ;;  %v310_v38 = vld [vmem:[%s1233_s17 + $0x28] sm:$0xff]  ;;  %v327_v45 = vld [vmem:[#allocation5 + $0x20] sm:$0xff]  ;;  %v342_v50 = vadd.f32 %v324_v25, %v306_v23  ;;  %v348_v55 = vadd.f32 %v330_v30, %v312_v27  ;;  %v343_v56 = vadd.f32 %v325_v39, %v307_v31  ;;  %s726_s25 = sshll.u32 %s1516_s8, 4  ;;  %s973_s29 = scalar_lea.vmem %s972_s11, 4608  ;;  %s1569_s25 = int_to_ptr.vmem [resolvable:$true] %s726_s25 }
  0x61   : > { %v328_v46 = vld [vmem:[#allocation5 + $0x28] sm:$0xff]  ;;  %v313_v52 = vld [vmem:[%s1233_s17 + $0x40] sm:$0xff]  ;;  %v315_v54 = vld [vmem:[%s1233_s17 + $0x50] sm:$0xff]  ;;  %v403_v57 = vrot.slane %v367_v13, %v1277_v33  ;;  %v434_v58 = vrot.slane %v371_v15, %v1277_v33  ;;  %v344_v0 = vadd.f32 %v326_v44, %v308_v32  ;;  %v345_v1 = vadd.f32 %v327_v45, %v309_v37  ;;  %s967_s26 = scalar_lea.vmem %s1569_s25, 2304  ;;  %p974_p11 = scmp.lt.s32.totalorder %s1569_s25, %s972_s11 }
  0x62   : > { %v314_v53 = vld [vmem:[%s1233_s17 + $0x48] sm:$0xff]  ;;  %v316_v59 = vld [vmem:[%s1233_s17 + $0x58] sm:$0xff]  ;;  %v331_v60 = vld [vmem:[#allocation5 + $0x40] sm:$0xff]  ;;  %v346_v2 = vadd.f32 %v328_v46, %v310_v38  ;;  %v407_v3 = vrot.slane %v367_v13, %v1288_v40  ;;  %v1309_v7 = vrot.slane %v367_v13, %v1296_v47  ;;  %v438_v8 = vrot.slane %v371_v15, %v1288_v40  ;;  %p968_p6 = scmp.ne.s32.totalorder %s1569_s25, %s967_s26  ;;  %p975_p3 = scmp.lt.s32.totalorder %s973_s29, %s967_s26 }
  0x63   : > { %v332_v61 = vld [vmem:[#allocation5 + $0x48] sm:$0xff]  ;;  %v333_v4 = vld [vmem:[#allocation5 + $0x50] sm:$0xff]  ;;  %v334_v5 = vld [vmem:[#allocation5 + $0x58] sm:$0xff]  ;;  %v1313_v9 = vrot.slane %v371_v15, %v1296_v47  ;;  %v349_v19 = vadd.f32 %v331_v60, %v313_v52 }
  0x64   : > { %379 = vperm.xlu0 %901, %v373_v6   ;;  %v319_v6 = vld [vmem:[%s1233_s17 + $0x70] sm:$0xff]  ;;  %v320_v10 = vld [vmem:[%s1233_s17 + $0x78] sm:$0xff]  ;;  %v350_v20 = vadd.f32 %v332_v61, %v314_v53  ;;  %v351_v15 = vadd.f32 %v333_v4, %v315_v54  ;;  %v352_v22 = vadd.f32 %v334_v5, %v316_v59  ;;  %v321_v32 = vld [vmem:[%s1233_s17 + $0x80] sm:$0xff]  ;;  %p969_p8 = pnand %p968_p6, %p1176_p12  ;;  %p976_p7 = por %p975_p3, %p974_p11 }
  0x65   : > { %v338_v12 = vld [vmem:[#allocation5 + $0x78] sm:$0xff]  ;;  %v355_v26 = vadd.f32 %v337_v11, %v319_v6  ;;  %v339_v37 = vld [vmem:[#allocation5 + $0x80] sm:$0xff]  ;;  %v340_v4 = vld [vmem:[#allocation5 + $0x88] sm:$0xff] }
  0x66   : > { %v356_v27 = vadd.f32 %v338_v12, %v320_v10  ;;  %v322_v61 = vld [vmem:[%s1233_s17 + $0x88] sm:$0xff]  ;;  %p970_p10 = pneg %p969_p8 }
  0x68   : > { %p977_p9 = pnand %p976_p7, %p970_p10 }
  0xdf   : > { %v1304_v62 = vpop.permute.xlu1 %382  ;;  %v377_v63 = vpop.permute.xlu0 %376 }
  0xe0   : > { %vm384_vm3 = vcmp.eq.s32.totalorder %v377_v63, 1  ;;  %vm386_vm4 = vcmp.eq.s32.totalorder %v1304_v62, 1 }
  0xe1   : > { %v449_v18 = vsel %vm384_vm3, %v1273_v29, %v422_v36  ;;  %v450_v13 = vsel %vm384_vm3, %v1280_v34, %v426_v41  ;;  %v451_v21 = vsel %vm384_vm3, %v1283_v35, %v1292_v42  ;;  %v461_v28 = vsel %vm386_vm4, %v1273_v29, %v422_v36 }
  0xe2   : > { %v1324_v23 = vadd.f32 %v449_v18, %v341_v49  ;;  %v1326_v24 = vadd.f32 %v450_v13, %v342_v50  ;;  %v462_v30 = vsel %vm386_vm4, %v1280_v34, %v426_v41  ;;  %v452_v31 = vsel %vm384_vm3, %v403_v57, %v434_v58 }
  0xe3   : > { %v380_v25 = vpop.permute.xlu0 %379  ;;  %v453_v44 = vsel %vm384_vm3, %v407_v3, %v438_v8  ;;  %v469_v45 = vadd.f32 %v451_v21, %v343_v56  ;;  %v454_v53 = vsel %vm384_vm3, %v1309_v7, %v1313_v9 }
  0xe4   : > { %vm385_vm5 = vcmp.eq.s32.totalorder %v380_v25, 1  ;;  %v485_v52 = vadd.f32 %v1326_v24, %v1324_v23  ;;  %v471_v56 = vadd.f32 %v453_v44, %v345_v1  ;;  %v472_v10 = vadd.f32 %v454_v53, %v346_v2 }
  0xe5   : > { %v455_v38 = vsel %vm385_vm5, %v1273_v29, %v422_v36  ;;  %v456_v39 = vsel %vm385_vm5, %v1280_v34, %v426_v41  ;;  %v457_v46 = vsel %vm385_vm5, %v1283_v35, %v1292_v42  ;;  %v463_v29 = vsel %vm386_vm4, %v1283_v35, %v1292_v42 }
  0xe6   : > { %v473_v49 = vadd.f32 %v455_v38, %v347_v51  ;;  %v474_v50 = vadd.f32 %v456_v39, %v348_v55  ;;  %v1351_v34 = vadd.f32 %v461_v28, %v1294_v43  ;;  %v1353_v36 = vadd.f32 %v462_v30, %v354_v48 }
  0xe7   : > { %v357_v41 = vadd.f32 %v339_v37, %v321_v32  ;;  %v470_v51 = vadd.f32 %v452_v31, %v344_v0  ;;  %v486_v54 = vadd.f32 %v485_v52, %v469_v45  ;;  %v458_v55 = vsel %vm385_vm5, %v403_v57, %v434_v58 }
  0xe8   : > { %v475_v59 = vadd.f32 %v457_v46, %v349_v19  ;;  %v492_v60 = vadd.f32 %v474_v50, %v473_v49  ;;  %v464_v35 = vsel %vm386_vm4, %v403_v57, %v434_v58  ;;  %v459_v43 = vsel %vm385_vm5, %v407_v3, %v438_v8 }
  0xe9   : > { %v487_v42 = vadd.f32 %v486_v54, %v470_v51  ;;  %v465_v48 = vsel %vm386_vm4, %v407_v3, %v438_v8  ;;  %v481_v63 = vadd.f32 %v463_v29, %v355_v26  ;;  %v476_v5 = vadd.f32 %v458_v55, %v350_v20 }
  0xea   : > { %v493_v0 = vadd.f32 %v492_v60, %v475_v59  ;;  %v482_v6 = vadd.f32 %v464_v35, %v356_v27  ;;  %v499_v1 = vadd.f32 %v1353_v36, %v1351_v34  ;;  %v460_v12 = vsel %vm385_vm5, %v1309_v7, %v1313_v9 }
  0xeb   : > { %v488_v11 = vadd.f32 %v487_v42, %v471_v56  ;;  %v358_v57 = vadd.f32 %v340_v4, %v322_v61  ;;  %v477_v58 = vadd.f32 %v459_v43, %v351_v15  ;;  %v483_v19 = vadd.f32 %v465_v48, %v357_v41 }
  0xec   : > { %v494_v18 = vadd.f32 %v493_v0, %v476_v5  ;;  %v500_v13 = vadd.f32 %v499_v1, %v481_v63  ;;  %v466_v3 = vsel %vm386_vm4, %v1309_v7, %v1313_v9  ;;  %v478_v8 = vadd.f32 %v460_v12, %v352_v22 }
  0xed   : > { %v489_v21 = vadd.f32 %v488_v11, %v472_v10  ;;  %v484_v27 = vadd.f32 %v466_v3, %v358_v57 }
  0xee   : > { %v495_v20 = vadd.f32 %v494_v18, %v477_v58  ;;  %v501_v26 = vadd.f32 %v500_v13, %v482_v6 }
  0xef   : > { %490 = vadd.xlane.f32.xlu1 %v489_v21 }
  0xf0   : > { %v496_v2 = vadd.f32 %v495_v20, %v478_v8  ;;  %v502_v28 = vadd.f32 %v501_v26, %v483_v19 }
  0xf2   : > { %497 = vadd.xlane.f32.xlu0 %v496_v2  ;;  %v503_v25 = vadd.f32 %v502_v28, %v484_v27 }
  0xf6   : > { %504 = vadd.xlane.f32.xlu0 %v503_v25 }
 0x17c   : > { %v491_v15 = vpop.xlane.xlu1 %490 }
 0x17d   : > { %v507_v30 = vmul.f32 0.0013020834, %v491_v15 }
 0x17f   : > { %v498_v31 = vpop.xlane.xlu0 %497  ;;  %v1375_v32 = vsub.f32 %v1324_v23, %v507_v30  ;;  %v1378_v37 = vsub.f32 %v1326_v24, %v507_v30  ;;  %v1380_v62 = vsub.f32 %v469_v45, %v507_v30  ;;  %v1382_v9 = vsub.f32 %v470_v51, %v507_v30 }
 0x180   : > { %v508_v7 = vmul.f32 0.0013020834, %v498_v31  ;;  %v1384_v22 = vsub.f32 %v471_v56, %v507_v30  ;;  %v1400_v53 = vsub.f32 %v472_v10, %v507_v30 }
 0x181   : > { %v528_v38 = vmul.f32 %v1375_v32, %v1375_v32  ;;  %v529_v39 = vmul.f32 %v1378_v37, %v1378_v37  ;;  %v530_v24 = vmul.f32 %v1380_v62, %v1380_v62 }
 0x182   : > { %v1390_v44 = vsub.f32 %v473_v49, %v508_v7  ;;  %v1392_v23 = vsub.f32 %v474_v50, %v508_v7  ;;  %v1396_v52 = vsub.f32 %v475_v59, %v508_v7  ;;  %v1398_v29 = vsub.f32 %v476_v5, %v508_v7 }
 0x183   : > { %v505_v46 = vpop.xlane.xlu0 %504  ;;  %v546_v45 = vadd.f32 %v529_v39, %v528_v38  ;;  %v531_v50 = vmul.f32 %v1382_v9, %v1382_v9  ;;  %v532_v54 = vmul.f32 %v1384_v22, %v1384_v22  ;;  %v1410_v56 = vsub.f32 %v477_v58, %v508_v7 }
 0x184   : > { %v509_v41 = vmul.f32 0.0013020834, %v505_v46  ;;  %v534_v51 = vmul.f32 %v1390_v44, %v1390_v44  ;;  %v535_v49 = vmul.f32 %v1392_v23, %v1392_v23  ;;  %v536_v59 = vmul.f32 %v1396_v52, %v1396_v52 }
 0x185   : > { %v547_v55 = vadd.f32 %v546_v45, %v530_v24  ;;  %v1420_v42 = vsub.f32 %v478_v8, %v508_v7  ;;  %v537_v43 = vmul.f32 %v1398_v29, %v1398_v29  ;;  %v538_v11 = vmul.f32 %v1410_v56, %v1410_v56  ;;  %v594_v24 = vld [vmem:[%s1623_s4] sm:$0x3f] }
 0x186   : > { %v553_v60 = vadd.f32 %v535_v49, %v534_v51  ;;  %v1415_v61 = vsub.f32 %v1351_v34, %v509_v41  ;;  %v1418_v4 = vsub.f32 %v1353_v36, %v509_v41  ;;  %v1424_v48 = vsub.f32 %v481_v63, %v509_v41 }
 0x187   : > { %v548_v35 = vadd.f32 %v547_v55, %v531_v50  ;;  %v1426_v0 = vsub.f32 %v482_v6, %v509_v41  ;;  %v533_v36 = vmul.f32 %v1400_v53, %v1400_v53  ;;  %v1436_v57 = vsub.f32 %v483_v19, %v509_v41 }
 0x188   : > { %v554_v5 = vadd.f32 %v553_v60, %v536_v59  ;;  %v540_v1 = vmul.f32 %v1415_v61, %v1415_v61  ;;  %v541_v34 = vmul.f32 %v1418_v4, %v1418_v4  ;;  %v542_v63 = vmul.f32 %v1424_v48, %v1424_v48 }
 0x189   : > { %v549_v10 = vadd.f32 %v548_v35, %v532_v54  ;;  %v539_v18 = vmul.f32 %v1420_v42, %v1420_v42  ;;  %v1442_v21 = vsub.f32 %v484_v27, %v509_v41  ;;  %v543_v3 = vmul.f32 %v1426_v0, %v1426_v0  ;;  %v644_v41 = vld [vmem:[%s1624_s5] sm:$0x3f] }
 0x18a   : > { %v555_v12 = vadd.f32 %v554_v5, %v537_v43  ;;  %v560_v6 = vadd.f32 %v541_v34, %v540_v1  ;;  %v544_v19 = vmul.f32 %v1436_v57, %v1436_v57  ;;  %v1457_v51 = vrot.slane %v594_v24, %v1260_v14 }
 0x18b   : > { %v550_v58 = vadd.f32 %v549_v10, %v533_v36  ;;  %v545_v2 = vmul.f32 %v1442_v21, %v1442_v21  ;;  %v1460_v49 = vrot.slane %v594_v24, %v1262_v16  ;;  %v1463_v50 = vrot.slane %v594_v24, %v1264_v17 }
 0x18c   : > { %v556_v13 = vadd.f32 %v555_v12, %v538_v11  ;;  %v561_v8 = vadd.f32 %v560_v6, %v542_v63  ;;  %v1466_v54 = vrot.slane %v644_v41, %v1260_v14  ;;  %v1469_v55 = vrot.slane %v644_v41, %v1262_v16 }
 0x18d   : > { %551 = vadd.xlane.f32.xlu1 %v550_v58  ;;  %v1472_v59 = vrot.slane %v594_v24, %v1277_v33  ;;  %v1475_v35 = vrot.slane %v644_v41, %v1264_v17  ;;  %v1478_v43 = vrot.slane %v594_v24, %v1288_v40  ;;  %v1481_v5 = vrot.slane %v594_v24, %v1296_v47 }
 0x18e   : > { %v557_v20 = vadd.f32 %v556_v13, %v539_v18  ;;  %v562_v26 = vadd.f32 %v561_v8, %v543_v3  ;;  %v1484_v1 = vrot.slane %v644_v41, %v1277_v33  ;;  %v1491_v17 = vrot.slane %v644_v41, %v1288_v40 }
 0x18f   : > { %v1494_v10 = vrot.slane %v644_v41, %v1296_v47 }
 0x190   : > { %558 = vadd.xlane.f32.xlu0 %v557_v20  ;;  %v563_v28 = vadd.f32 %v562_v26, %v544_v19 }
 0x192   : > { %v564_v25 = vadd.f32 %v563_v28, %v545_v2 }
 0x194   : > { %565 = vadd.xlane.f32.xlu1 %v564_v25 }
 0x21a   : > { %v552_v15 = vpop.xlane.xlu1 %551 }
 0x21b   : > { %v567_v27 = vmul.f32 0.0013020834, %v552_v15 }
 0x21d   : > { %v570_v30 = vadd.f32 1e-12, %v567_v27  ;;  %v559_v31 = vpop.xlane.xlu0 %558 }
 0x21e   : > { %v568_v7 = vmul.f32 0.0013020834, %v559_v31 }
 0x21f   : > { %903 = vrsqrt.f32 %v570_v30 }
 0x220   : > { %v571_v38 = vadd.f32 1e-12, %v568_v7 }
 0x221   : > { %v566_v39 = vpop.xlane.xlu1 %565 }
 0x222   : > { %905 = vrsqrt.f32 %v571_v38  ;;  %v569_v46 = vmul.f32 0.0013020834, %v566_v39 }
 0x224   : > { %v572_v45 = vadd.f32 1e-12, %v569_v46 }
 0x226   : > { %907 = vrsqrt.f32 %v572_v45 }
 0x229   : > { %v904_v60 = vpop.eup %903 }
 0x22a   : > { %v576_v14 = vmul.f32 %v904_v60, %v1375_v32  ;;  %v577_v16 = vmul.f32 %v904_v60, %v1378_v37  ;;  %v578_v34 = vmul.f32 %v904_v60, %v1380_v62  ;;  %v579_v36 = vmul.f32 %v904_v60, %v1382_v9 }
 0x22b   : > { %v580_v11 = vmul.f32 %v904_v60, %v1384_v22  ;;  %v581_v12 = vmul.f32 %v904_v60, %v1400_v53 }
 0x22c   : > { %v906_v33 = vpop.eup %905  ;;  %v626_v63 = vmul.f32 %v1457_v51, %v576_v14  ;;  %v627_v32 = vmul.f32 %v1460_v49, %v577_v16  ;;  %v628_v37 = vmul.f32 %v1463_v50, %v578_v34  ;;  %v629_v62 = vmul.f32 %v1472_v59, %v579_v36 }
 0x22d   : > { %v630_v40 = vmul.f32 %v1478_v43, %v580_v11  ;;  %v631_v9 = vmul.f32 %v1481_v5, %v581_v12  ;;  %v582_v47 = vmul.f32 %v906_v33, %v1390_v44  ;;  %v583_v22 = vmul.f32 %v906_v33, %v1392_v23 }
 0x22e   : > { %v676_v53 = vadd.f32 %v1466_v54, %v626_v63  ;;  %v677_v6 = vadd.f32 %v1469_v55, %v627_v32  ;;  %v678_v58 = vadd.f32 %v1475_v35, %v628_v37  ;;  %v679_v18 = vadd.f32 %v1484_v1, %v629_v62 }
 0x22f   : > { %v680_v13 = vadd.f32 %v1491_v17, %v630_v40  ;;  %v681_v3 = vadd.f32 %v1494_v10, %v631_v9  ;;  %v584_v8 = vmul.f32 %v906_v33, %v1396_v52  ;;  %v585_v20 = vmul.f32 %v906_v33, %v1398_v29 }
 0x230   : > { %v908_v19 = vpop.eup %907  ;;  %694 = vst [vmem:[%s1516_s8] sm:$0xff] %v676_v53  ;;  %695 = vst [vmem:[%s1516_s8 + $0x8] sm:$0xff] %v677_v6  ;;  %v586_v44 = vmul.f32 %v906_v33, %v1410_v56  ;;  %v587_v23 = vmul.f32 %v906_v33, %v1420_v42  ;;  %v632_v52 = vmul.f32 %v1457_v51, %v582_v47 }
 0x231   : > { %696 = vst [vmem:[%s1516_s8 + $0x10] sm:$0xff] %v678_v58  ;;  %697 = vst [vmem:[%s1516_s8 + $0x18] sm:$0xff] %v679_v18  ;;  %v633_v29 = vmul.f32 %v1460_v49, %v583_v22  ;;  %v634_v26 = vmul.f32 %v1463_v50, %v584_v8  ;;  %v635_v2 = vmul.f32 %v1472_v59, %v585_v20 }
 0x232   : > { %698 = vst [vmem:[%s1516_s8 + $0x20] sm:$0xff] %v680_v13  ;;  %699 = vst [vmem:[%s1516_s8 + $0x28] sm:$0xff] %v681_v3  ;;  %v588_v28 = vmul.f32 %v908_v19, %v1415_v61  ;;  %v589_v25 = vmul.f32 %v908_v19, %v1418_v4  ;;  %v636_v56 = vmul.f32 %v1478_v43, %v586_v44 }
 0x233   : > { %v637_v42 = vmul.f32 %v1481_v5, %v587_v23  ;;  %v682_v15 = vadd.f32 %v1466_v54, %v632_v52  ;;  %v683_v27 = vadd.f32 %v1469_v55, %v633_v29  ;;  %v684_v30 = vadd.f32 %v1475_v35, %v634_v26 }
 0x234   : > { %v685_v31 = vadd.f32 %v1484_v1, %v635_v2  ;;  %v590_v7 = vmul.f32 %v908_v19, %v1424_v48  ;;  %v591_v61 = vmul.f32 %v908_v19, %v1426_v0  ;;  %v686_v4 = vadd.f32 %v1491_v17, %v636_v56 }
 0x235   : > { %v687_v38 = vadd.f32 %v1494_v10, %v637_v42  ;;  %700 = vst [vmem:[%s1516_s8 + $0x30] sm:$0xff] %v682_v15  ;;  %701 = vst [vmem:[%s1516_s8 + $0x38] sm:$0xff] %v683_v27  ;;  %v592_v39 = vmul.f32 %v908_v19, %v1436_v57  ;;  %v593_v46 = vmul.f32 %v908_v19, %v1442_v21 }
 0x236   : > { %702 = vst [vmem:[%s1516_s8 + $0x40] sm:$0xff] %v684_v30  ;;  %703 = vst [vmem:[%s1516_s8 + $0x48] sm:$0xff] %v685_v31  ;;  %v638_v24 = vmul.f32 %v1457_v51, %v588_v28  ;;  %v639_v48 = vmul.f32 %v1460_v49, %v589_v25  ;;  %v640_v0 = vmul.f32 %v1463_v50, %v590_v7 }
 0x237   : > { %v641_v45 = vmul.f32 %v1472_v59, %v591_v61  ;;  %704 = vst [vmem:[%s1516_s8 + $0x50] sm:$0xff] %v686_v4  ;;  %705 = vst [vmem:[%s1516_s8 + $0x58] sm:$0xff] %v687_v38  ;;  %v642_v57 = vmul.f32 %v1478_v43, %v592_v39  ;;  %v643_v21 = vmul.f32 %v1481_v5, %v593_v46 }
 0x238   : > { %v688_v41 = vadd.f32 %v1466_v54, %v638_v24  ;;  %v689_v51 = vadd.f32 %v1469_v55, %v639_v48  ;;  %v690_v49 = vadd.f32 %v1475_v35, %v640_v0 }
 0x239   : > { %v691_v50 = vadd.f32 %v1484_v1, %v641_v45  ;;  %v692_v59 = vadd.f32 %v1491_v17, %v642_v57  ;;  %v693_v60 = vadd.f32 %v1494_v10, %v643_v21 }
 0x23a   : > { %706 = vst [vmem:[%s1516_s8 + $0x60] sm:$0xff] %v688_v41  ;;  %707 = vst [vmem:[%s1516_s8 + $0x68] sm:$0xff] %v689_v51 }
 0x23b   : > { %708 = vst [vmem:[%s1516_s8 + $0x70] sm:$0xff] %v690_v49  ;;  %709 = vst [vmem:[%s1516_s8 + $0x78] sm:$0xff] %v691_v50 }
 0x23c   : > { %710 = vst [vmem:[%s1516_s8 + $0x80] sm:$0xff] %v692_v59  ;;  %711 = vst [vmem:[%s1516_s8 + $0x88] sm:$0xff] %v693_v60 }
 0x23d   : > { %980 = shalt.err (!%p977_p9)
}
 0x23e   : > { %s981_s17 = scalar_lea.hbm %s1565_s18, 2304  ;;  %s985_s30 = scalar_lea.hbm %s1625_s6, 4608 }
 0x23f   : > { %p982_p1 = scmp.ne.s32.totalorder %s1565_s18, %s981_s17  ;;  %p986_p13 = scmp.lt.u32.totalorder %s1565_s18, %s1625_s6 }
 0x240   : > { %p987_p2 = scmp.lt.u32.totalorder %s985_s30, %s981_s17  ;;  %p989_p6 = scmp.lt.u32.totalorder %s981_s17, %s1565_s18 }
 0x241   : > { %p983_p0 = pnand %p982_p1, %p1176_p12 }
 0x242   : > { %p988_p4 = por %p987_p2, %p986_p13 }
 0x243   : > { %p984_p5 = pneg %p983_p0 }
 0x244   : > { %p990_p8 = por %p989_p6, %p988_p4 }
 0x246   : > { %p991_p10 = pnand %p990_p8, %p984_p5 }
 0x248   : > { %994 = shalt.err (!%p991_p10)
}
 0x249   : > { %s1045_s27 = smov 768   ;;  %s1046_s16 = smov 48  }
 0x24a   : > { %845 = dma.vmem_to_hbm [thread:$0]  (%p1176_p12), %s1569_s25, 2304, %s1565_s18, %s713_s20, %s1045_s27, %s1045_s27, %s1046_s16  }
 0x24b PF: > { %s741_s26 = sand.u32 1, %s1025_s21   ;;  %p1644_p11 = scmp.ne.s32.totalorder %s1632_s28, 0 }
 0x24c   : > { %p1645_p3 = scmp.ge.s32.totalorder %s1037_s24, 2  ;;  %s742_s12 = scalar_lea.sflag [#allocation4], %s741_s26 }
 0x24e   : > { %p856_p7 = pnand %p1645_p3, %p1644_p11 }
 0x250   : > { %1020 = dma.done.wait (!%p856_p7), %s742_s12, 2304  }
 0x251   : > { %1022 = vsyncadd (!%p856_p7), %s742_s12, 4294964992  ;;  %p20_p9 = scmp.ge.s32.totalorder %s1138_s9, 4   ;;  %s1646_s21 = smov %s1029_s22 }
 0x252   : > { %s1647_s22 = smov %s1033_s23  ;;  %s1648_s23 = smov %s1172_s13 }
 0x253   : > { %s1649_s24 = smov %s1138_s9  ;;  %22 = sbr.rel (!%p20_p9) target bundleno = 6 (0x6), region = 97 }
 0x25a   :  { %747 = vsyncpa [#allocation3], 1 }
 0x25b   :  { %749 = vsyncpa [#allocation3 + $0x1], 1 }
 0x25c   :  { %750 = vsyncpa [#allocation6], 1 }
 0x25d   :  { %751 = vsyncpa [#allocation4], 1 }
 0x25e   :  { %753 = vsyncpa [#allocation4 + $0x1], 1 }

</bundles_post_ra>
